<compile_context>
chip_gen: v7x
topology: tpu7x:2x2x1
jax: 0.10.0
libtpu: 0.0.40
codegen_flags: <defaults>
</compile_context>

<pallas_src>
import jax
import jax.numpy as jnp
from jax.experimental import pallas as pl
from jax.experimental.pallas import tpu as pltpu


def _gru_block_kernel(x_ref, wih_ref, whh_ref, gib_ref, bhhn_ref,
                      out_ref, h_scratch):
    """One grid step == one time block of the GRU (full batch)."""
    t_blk = pl.program_id(0)

    @pl.when(t_blk == 0)
    def _():
        # PyTorch nn.GRU default initial hidden state is zeros.
        h_scratch[...] = jnp.zeros_like(h_scratch)

    B, H = h_scratch.shape
    TT = x_ref.shape[0] // B

    # ---- hoisted input projection: one bf16 GEMM for the whole time block ---
    # gi_all[t*B + b, :] = x[t, b] @ W_ih^T + (b_ih + [b_hh_r, b_hh_z, 0])
    gi_all = jnp.dot(x_ref[...], wih_ref[...],
                     preferred_element_type=jnp.float32) + gib_ref[...]

    whh = whh_ref[...]                                  # (H, 3H) bf16, r|z|n
    bhh_n = jnp.broadcast_to(bhhn_ref[...], (B, H))     # hoisted out of the loop

    # ---- sequential recurrence: only h @ W_hh^T remains per step ------------
    h = h_scratch[...]                                  # (B, H) f32 carry
    for k in range(TT):                                 # TT is small & static
        gi = gi_all[k * B:(k + 1) * B, :]               # contiguous row block
        gh = jnp.dot(h.astype(whh.dtype), whh,
                     preferred_element_type=jnp.float32)
        r = jax.nn.sigmoid(gi[:, 0:H] + gh[:, 0:H])
        z = jax.nn.sigmoid(gi[:, H:2 * H] + gh[:, H:2 * H])
        n = jnp.tanh(gi[:, 2 * H:] + r * (gh[:, 2 * H:] + bhh_n))
        h = (1.0 - z) * n + z * h
        # Per-step write into the lane-dense output slab (static column slice).
        out_ref[:, k * H:(k + 1) * H] = h.astype(out_ref.dtype)

    h_scratch[...] = h


def _tile_vmem_bytes(B, TT, F, H):
    """Per-tile VMEM working-set estimate (bytes)."""
    x_tile = 2 * (TT * B * F) * 2          # bf16 x tile, double-buffered
    out_tile = 2 * (B * TT * H) * 4        # f32 out slab, double-buffered
    weights = (F * 3 * H + H * 3 * H) * 2  # bf16 weights, single-buffered
    biases = (3 * H + H) * 4               # f32 fused bias + n-gate bias
    gi_all = (TT * B * 3 * H) * 4          # f32 hoisted projection
    h_state = B * H * 4
    return x_tile + out_tile + weights + biases + gi_all + h_state


def _pick_time_block(B, T, F, H, max_tt=32, vmem_budget=24 << 20):
    """Timesteps per grid step.  tt must divide T; (tt*B) % 8 == 0 and
    (tt*H) % 128 == 0 keep the x tile / out slab layout-legal & lane-dense
    (tt == T trivially satisfies both since the block equals the full dim).
    Among legal candidates take the largest whose per-tile working set fits
    the budget (sized for v7x's 64 MiB VMEM), else the smallest legal one."""
    legal = []
    for tt in range(1, min(T, max_tt) + 1):
        if T % tt:
            continue
        if tt != T and ((tt * B) % 8 or (tt * H) % 128):
            continue
        legal.append(tt)
    if not legal:
        return T  # whole sequence in one block (always layout-legal)
    fitting = [tt for tt in legal if _tile_vmem_bytes(B, tt, F, H) <= vmem_budget]
    return max(fitting) if fitting else min(legal)


@jax.jit
def encoder_forward(x_btf, w_ih, w_hh, b_ih, b_hh):
    """GRU encoder forward (PyTorch nn.GRU, batch_first=True, 1 layer).

    x_btf : (B, T, F) float32
    w_ih  : (3H, F), w_hh : (3H, H), b_ih / b_hh : (3H,)   (PyTorch layout)

    Returns (output, hidden): output (B, T, H) f32, hidden (1, B, H) f32.
    """
    B, T, F = x_btf.shape
    H = w_hh.shape[1]

    TT = _pick_time_block(B, T, F, H)
    est = _tile_vmem_bytes(B, TT, F, H)
    vmem_limit = int(min(max(2 * est + (4 << 20), 32 << 20), 56 << 20))

    # ---- operand prep (layout plumbing + dtype) ------------------------------
    # t-major, 2-D x so each recurrence step is a contiguous row block.
    x_2d = jnp.transpose(x_btf, (1, 0, 2)).reshape(T * B, F).astype(jnp.bfloat16)
    wih_t = jnp.transpose(w_ih).astype(jnp.bfloat16)        # (F, 3H)
    whh_t = jnp.transpose(w_hh).astype(jnp.bfloat16)        # (H, 3H)
    # Fold b_ih and the r/z parts of b_hh into the hoisted input-GEMM bias.
    gib = (b_ih + jnp.concatenate(
        [b_hh[:2 * H], jnp.zeros((H,), b_hh.dtype)])).reshape(1, 3 * H)
    gib = gib.astype(jnp.float32)
    bhh_n = b_hh[2 * H:].reshape(1, H).astype(jnp.float32)

    out_flat = pl.pallas_call(
        _gru_block_kernel,
        out_shape=jax.ShapeDtypeStruct((B, T * H), jnp.float32),
        grid_spec=pltpu.PrefetchScalarGridSpec(
            num_scalar_prefetch=0,
            grid=(T // TT,),
            in_specs=[
                # x time-block tile: (TT*B, F), t-major.
                pl.BlockSpec((TT * B, F), lambda t: (t, 0)),
                # Grid-invariant operands: single-buffered.
                pl.BlockSpec((F, 3 * H), lambda t: (0, 0),
                             pipeline_mode=pl.Buffered(1)),   # W_ih^T
                pl.BlockSpec((H, 3 * H), lambda t: (0, 0),
                             pipeline_mode=pl.Buffered(1)),   # W_hh^T
                pl.BlockSpec((1, 3 * H), lambda t: (0, 0),
                             pipeline_mode=pl.Buffered(1)),   # fused bias
                pl.BlockSpec((1, H), lambda t: (0, 0),
                             pipeline_mode=pl.Buffered(1)),   # b_hh (n gate)
            ],
            out_specs=pl.BlockSpec((B, TT * H), lambda t: (0, t)),
            scratch_shapes=[pltpu.VMEM((B, H), jnp.float32)],  # carried h_t
        ),
        compiler_params=pltpu.CompilerParams(
            # The time axis carries the hidden state -> sequential.
            dimension_semantics=("arbitrary",),
            vmem_limit_bytes=vmem_limit,
        ),
    )(x_2d, wih_t, whh_t, gib, bhh_n)

    output = out_flat.reshape(B, T, H)          # free (contiguous) reshape
    hidden = output[:, -1, :][None, :, :]       # (1, B, H), num_layers = 1
    return output, hidden


def _reference_gru(x_btf, w_ih, w_hh, b_ih, b_hh):
    """Pure-JAX f32 reference implementing PyTorch nn.GRU semantics."""
    B, T, F = x_btf.shape
    H = w_hh.shape[1]
    h0 = jnp.zeros((B, H), jnp.float32)

    def step(h, x_t):
        gi = x_t @ w_ih.T + b_ih
        gh = h @ w_hh.T + b_hh
        r = jax.nn.sigmoid(gi[:, 0:H] + gh[:, 0:H])
        z = jax.nn.sigmoid(gi[:, H:2 * H] + gh[:, H:2 * H])
        n = jnp.tanh(gi[:, 2 * H:3 * H] + r * gh[:, 2 * H:3 * H])
        h_new = (1.0 - z) * n + z * h
        return h_new, h_new

    h_last, outs = jax.lax.scan(step, h0, jnp.transpose(x_btf, (1, 0, 2)))
    return jnp.transpose(outs, (1, 0, 2)), h_last[None, :, :]


if __name__ == "__main__":
    # Small shapes consistent with Encoder(feature_size, hidden_size):
    B, T, F, H = 2, 8, 4, 32

    key = jax.random.PRNGKey(0)
    kx, k1, k2, k3, k4 = jax.random.split(key, 5)

    # Deterministic PyTorch-style uniform(-1/sqrt(H), 1/sqrt(H)) init.
    bound = 1.0 / jnp.sqrt(jnp.float32(H))
    w_ih = jax.random.uniform(k1, (3 * H, F), jnp.float32, -bound, bound)
    w_hh = jax.random.uniform(k2, (3 * H, H), jnp.float32, -bound, bound)
    b_ih = jax.random.uniform(k3, (3 * H,), jnp.float32, -bound, bound)
    b_hh = jax.random.uniform(k4, (3 * H,), jnp.float32, -bound, bound)

    x = jax.random.normal(kx, (B, T, F), jnp.float32)

    output, hidden = encoder_forward(x, w_ih, w_hh, b_ih, b_hh)
    jax.block_until_ready((output, hidden))

    ref_out, ref_hid = _reference_gru(x, w_ih, w_hh, b_ih, b_hh)
    assert output.shape == (B, T, H) and hidden.shape == (1, B, H)
    # bf16 matmul operands (f32 accumulation / gate math) -> relaxed tolerance.
    assert jnp.allclose(output, ref_out, atol=5e-2, rtol=5e-2)
    assert jnp.allclose(hidden, ref_hid, atol=5e-2, rtol=5e-2)

    print("KERNEL_OK")
</pallas_src>

<mosaic_0001>
module attributes {stable_mosaic.version = 11 : i64} {
  func.func @_gru_block_kernel(%arg0: i32, %arg1: memref<16x4xbf16, #tpu.memory_space<vmem>>, %arg2: memref<4x96xbf16, #tpu.memory_space<vmem>>, %arg3: memref<32x96xbf16, #tpu.memory_space<vmem>>, %arg4: memref<1x96xf32, #tpu.memory_space<vmem>>, %arg5: memref<1x32xf32, #tpu.memory_space<vmem>>, %arg6: memref<2x256xf32, #tpu.memory_space<vmem>>, %arg7: memref<2x32xf32, #tpu.memory_space<vmem>>) attributes {dimension_semantics = [#tpu.dimension_semantics<arbitrary>], iteration_bounds = array<i64: 1>, scalar_prefetch = 0 : i64, scratch_operands = 1 : i64, tpu.core_type = #tpu.core_type<tc>, window_params = [{transform_indices = @transform_0, window_bounds = array<i64: 16, 4>}, {pipeline_mode = #tpu.pipeline_mode<synchronous>, transform_indices = @transform_1, window_bounds = array<i64: 4, 96>}, {pipeline_mode = #tpu.pipeline_mode<synchronous>, transform_indices = @transform_2, window_bounds = array<i64: 32, 96>}, {pipeline_mode = #tpu.pipeline_mode<synchronous>, transform_indices = @transform_3, window_bounds = array<i64: 1, 96>}, {pipeline_mode = #tpu.pipeline_mode<synchronous>, transform_indices = @transform_4, window_bounds = array<i64: 1, 32>}, {transform_indices = @transform_5, window_bounds = array<i64: 2, 256>}]} {
    %c0_i32 = arith.constant 0 : i32
    %0 = arith.cmpi eq, %arg0, %c0_i32 : i32
    %1 = arith.extui %0 : i1 to i32
    %c0_i32_0 = arith.constant 0 : i32
    %2 = arith.cmpi ne, %1, %c0_i32_0 : i32
    scf.if %2 {
      %cst_55 = arith.constant 0.000000e+00 : f32
      %263 = vector.broadcast %cst_55 : f32 to vector<2x32xf32>
      %c0_56 = arith.constant 0 : index
      %c0_57 = arith.constant 0 : index
      %264 = vector.load %arg7[%c0_56, %c0_57] : memref<2x32xf32, #tpu.memory_space<vmem>>, vector<2x32xf32>
      tpu.vector_store %arg7[%c0_56, %c0_57], %263 {strides = array<i32>} : memref<2x32xf32, #tpu.memory_space<vmem>>, vector<2x32xf32>,
    } else {
    }
    %c0 = arith.constant 0 : index
    %c0_1 = arith.constant 0 : index
    %3 = vector.load %arg1[%c0, %c0_1] : memref<16x4xbf16, #tpu.memory_space<vmem>>, vector<16x4xbf16>
    %c0_2 = arith.constant 0 : index
    %c0_3 = arith.constant 0 : index
    %4 = vector.load %arg2[%c0_2, %c0_3] : memref<4x96xbf16, #tpu.memory_space<vmem>>, vector<4x96xbf16>
    %cst = arith.constant dense<0.000000e+00> : vector<16x96xf32>
    %5 = tpu.matmul %3, %4, %cst {dimension_numbers = #tpu.dot_dimension_numbers<[1], [0], [0], [1], [0, 0, 1, 1], [], []>} : vector<16x4xbf16>, vector<4x96xbf16>, vector<16x96xf32> -> vector<16x96xf32>
    %c0_4 = arith.constant 0 : index
    %c0_5 = arith.constant 0 : index
    %6 = vector.load %arg4[%c0_4, %c0_5] : memref<1x96xf32, #tpu.memory_space<vmem>>, vector<1x96xf32>
    %7 = vector.broadcast %6 : vector<1x96xf32> to vector<16x96xf32>
    %8 = arith.addf %5, %7 : vector<16x96xf32>
    %c0_6 = arith.constant 0 : index
    %c0_7 = arith.constant 0 : index
    %9 = vector.load %arg3[%c0_6, %c0_7] : memref<32x96xbf16, #tpu.memory_space<vmem>>, vector<32x96xbf16>
    %c0_8 = arith.constant 0 : index
    %c0_9 = arith.constant 0 : index
    %10 = vector.load %arg5[%c0_8, %c0_9] : memref<1x32xf32, #tpu.memory_space<vmem>>, vector<1x32xf32>
    %11 = vector.shape_cast %10 : vector<1x32xf32> to vector<1x32xf32>
    %12 = vector.broadcast %11 : vector<1x32xf32> to vector<2x32xf32>
    %c0_10 = arith.constant 0 : index
    %c0_11 = arith.constant 0 : index
    %13 = vector.load %arg7[%c0_10, %c0_11] : memref<2x32xf32, #tpu.memory_space<vmem>>, vector<2x32xf32>
    %14 = vector.extract_strided_slice %8 {offsets = [0, 0], sizes = [2, 96], strides = [1, 1]} : vector<16x96xf32> to vector<2x96xf32>
    %15 = arith.truncf %13 : vector<2x32xf32> to vector<2x32xbf16>
    %cst_12 = arith.constant dense<0.000000e+00> : vector<2x96xf32>
    %16 = tpu.matmul %15, %9, %cst_12 {dimension_numbers = #tpu.dot_dimension_numbers<[1], [0], [0], [1], [0, 0, 1, 1], [], []>} : vector<2x32xbf16>, vector<32x96xbf16>, vector<2x96xf32> -> vector<2x96xf32>
    %17 = vector.extract_strided_slice %14 {offsets = [0, 0], sizes = [2, 32], strides = [1, 1]} : vector<2x96xf32> to vector<2x32xf32>
    %18 = vector.extract_strided_slice %16 {offsets = [0, 0], sizes = [2, 32], strides = [1, 1]} : vector<2x96xf32> to vector<2x32xf32>
    %19 = arith.addf %17, %18 : vector<2x32xf32>
    %20 = arith.negf %19 : vector<2x32xf32>
    %21 = math.exp %20 : vector<2x32xf32>
    %cst_13 = arith.constant 1.000000e+00 : f32
    %22 = vector.broadcast %cst_13 : f32 to vector<2x32xf32>
    %23 = arith.addf %22, %21 : vector<2x32xf32>
    %24 = arith.divf %22, %23 : vector<2x32xf32>
    %25 = vector.extract_strided_slice %14 {offsets = [0, 32], sizes = [2, 32], strides = [1, 1]} : vector<2x96xf32> to vector<2x32xf32>
    %26 = vector.extract_strided_slice %16 {offsets = [0, 32], sizes = [2, 32], strides = [1, 1]} : vector<2x96xf32> to vector<2x32xf32>
    %27 = arith.addf %25, %26 : vector<2x32xf32>
    %28 = arith.negf %27 : vector<2x32xf32>
    %29 = math.exp %28 : vector<2x32xf32>
    %cst_14 = arith.constant 1.000000e+00 : f32
    %30 = vector.broadcast %cst_14 : f32 to vector<2x32xf32>
    %31 = arith.addf %30, %29 : vector<2x32xf32>
    %32 = arith.divf %30, %31 : vector<2x32xf32>
    %33 = vector.extract_strided_slice %14 {offsets = [0, 64], sizes = [2, 32], strides = [1, 1]} : vector<2x96xf32> to vector<2x32xf32>
    %34 = vector.extract_strided_slice %16 {offsets = [0, 64], sizes = [2, 32], strides = [1, 1]} : vector<2x96xf32> to vector<2x32xf32>
    %35 = arith.addf %34, %12 : vector<2x32xf32>
    %36 = arith.mulf %24, %35 : vector<2x32xf32>
    %37 = arith.addf %33, %36 : vector<2x32xf32>
    %38 = math.tanh %37 : vector<2x32xf32>
    %cst_15 = arith.constant 1.000000e+00 : f32
    %39 = vector.broadcast %cst_15 : f32 to vector<2x32xf32>
    %40 = arith.subf %39, %32 : vector<2x32xf32>
    %41 = arith.mulf %40, %38 : vector<2x32xf32>
    %42 = arith.mulf %32, %13 : vector<2x32xf32>
    %43 = arith.addf %41, %42 : vector<2x32xf32>
    %c0_16 = arith.constant 0 : index
    %c0_17 = arith.constant 0 : index
    %44 = vector.load %arg6[%c0_16, %c0_17] : memref<2x256xf32, #tpu.memory_space<vmem>>, vector<2x32xf32>
    tpu.vector_store %arg6[%c0_16, %c0_17], %43 {strides = array<i32>} : memref<2x256xf32, #tpu.memory_space<vmem>>, vector<2x32xf32>,
    %45 = vector.extract_strided_slice %8 {offsets = [2, 0], sizes = [2, 96], strides = [1, 1]} : vector<16x96xf32> to vector<2x96xf32>
    %46 = arith.truncf %43 : vector<2x32xf32> to vector<2x32xbf16>
    %cst_18 = arith.constant dense<0.000000e+00> : vector<2x96xf32>
    %47 = tpu.matmul %46, %9, %cst_18 {dimension_numbers = #tpu.dot_dimension_numbers<[1], [0], [0], [1], [0, 0, 1, 1], [], []>} : vector<2x32xbf16>, vector<32x96xbf16>, vector<2x96xf32> -> vector<2x96xf32>
    %48 = vector.extract_strided_slice %45 {offsets = [0, 0], sizes = [2, 32], strides = [1, 1]} : vector<2x96xf32> to vector<2x32xf32>
    %49 = vector.extract_strided_slice %47 {offsets = [0, 0], sizes = [2, 32], strides = [1, 1]} : vector<2x96xf32> to vector<2x32xf32>
    %50 = arith.addf %48, %49 : vector<2x32xf32>
    %51 = arith.negf %50 : vector<2x32xf32>
    %52 = math.exp %51 : vector<2x32xf32>
    %cst_19 = arith.constant 1.000000e+00 : f32
    %53 = vector.broadcast %cst_19 : f32 to vector<2x32xf32>
    %54 = arith.addf %53, %52 : vector<2x32xf32>
    %55 = arith.divf %53, %54 : vector<2x32xf32>
    %56 = vector.extract_strided_slice %45 {offsets = [0, 32], sizes = [2, 32], strides = [1, 1]} : vector<2x96xf32> to vector<2x32xf32>
    %57 = vector.extract_strided_slice %47 {offsets = [0, 32], sizes = [2, 32], strides = [1, 1]} : vector<2x96xf32> to vector<2x32xf32>
    %58 = arith.addf %56, %57 : vector<2x32xf32>
    %59 = arith.negf %58 : vector<2x32xf32>
    %60 = math.exp %59 : vector<2x32xf32>
    %cst_20 = arith.constant 1.000000e+00 : f32
    %61 = vector.broadcast %cst_20 : f32 to vector<2x32xf32>
    %62 = arith.addf %61, %60 : vector<2x32xf32>
    %63 = arith.divf %61, %62 : vector<2x32xf32>
    %64 = vector.extract_strided_slice %45 {offsets = [0, 64], sizes = [2, 32], strides = [1, 1]} : vector<2x96xf32> to vector<2x32xf32>
    %65 = vector.extract_strided_slice %47 {offsets = [0, 64], sizes = [2, 32], strides = [1, 1]} : vector<2x96xf32> to vector<2x32xf32>
    %66 = arith.addf %65, %12 : vector<2x32xf32>
    %67 = arith.mulf %55, %66 : vector<2x32xf32>
    %68 = arith.addf %64, %67 : vector<2x32xf32>
    %69 = math.tanh %68 : vector<2x32xf32>
    %cst_21 = arith.constant 1.000000e+00 : f32
    %70 = vector.broadcast %cst_21 : f32 to vector<2x32xf32>
    %71 = arith.subf %70, %63 : vector<2x32xf32>
    %72 = arith.mulf %71, %69 : vector<2x32xf32>
    %73 = arith.mulf %63, %43 : vector<2x32xf32>
    %74 = arith.addf %72, %73 : vector<2x32xf32>
    %c0_22 = arith.constant 0 : index
    %c32 = arith.constant 32 : index
    %75 = vector.load %arg6[%c0_22, %c32] : memref<2x256xf32, #tpu.memory_space<vmem>>, vector<2x32xf32>
    tpu.vector_store %arg6[%c0_22, %c32], %74 {strides = array<i32>} : memref<2x256xf32, #tpu.memory_space<vmem>>, vector<2x32xf32>,
    %76 = vector.extract_strided_slice %8 {offsets = [4, 0], sizes = [2, 96], strides = [1, 1]} : vector<16x96xf32> to vector<2x96xf32>
    %77 = arith.truncf %74 : vector<2x32xf32> to vector<2x32xbf16>
    %cst_23 = arith.constant dense<0.000000e+00> : vector<2x96xf32>
    %78 = tpu.matmul %77, %9, %cst_23 {dimension_numbers = #tpu.dot_dimension_numbers<[1], [0], [0], [1], [0, 0, 1, 1], [], []>} : vector<2x32xbf16>, vector<32x96xbf16>, vector<2x96xf32> -> vector<2x96xf32>
    %79 = vector.extract_strided_slice %76 {offsets = [0, 0], sizes = [2, 32], strides = [1, 1]} : vector<2x96xf32> to vector<2x32xf32>
    %80 = vector.extract_strided_slice %78 {offsets = [0, 0], sizes = [2, 32], strides = [1, 1]} : vector<2x96xf32> to vector<2x32xf32>
    %81 = arith.addf %79, %80 : vector<2x32xf32>
    %82 = arith.negf %81 : vector<2x32xf32>
    %83 = math.exp %82 : vector<2x32xf32>
    %cst_24 = arith.constant 1.000000e+00 : f32
    %84 = vector.broadcast %cst_24 : f32 to vector<2x32xf32>
    %85 = arith.addf %84, %83 : vector<2x32xf32>
    %86 = arith.divf %84, %85 : vector<2x32xf32>
    %87 = vector.extract_strided_slice %76 {offsets = [0, 32], sizes = [2, 32], strides = [1, 1]} : vector<2x96xf32> to vector<2x32xf32>
    %88 = vector.extract_strided_slice %78 {offsets = [0, 32], sizes = [2, 32], strides = [1, 1]} : vector<2x96xf32> to vector<2x32xf32>
    %89 = arith.addf %87, %88 : vector<2x32xf32>
    %90 = arith.negf %89 : vector<2x32xf32>
    %91 = math.exp %90 : vector<2x32xf32>
    %cst_25 = arith.constant 1.000000e+00 : f32
    %92 = vector.broadcast %cst_25 : f32 to vector<2x32xf32>
    %93 = arith.addf %92, %91 : vector<2x32xf32>
    %94 = arith.divf %92, %93 : vector<2x32xf32>
    %95 = vector.extract_strided_slice %76 {offsets = [0, 64], sizes = [2, 32], strides = [1, 1]} : vector<2x96xf32> to vector<2x32xf32>
    %96 = vector.extract_strided_slice %78 {offsets = [0, 64], sizes = [2, 32], strides = [1, 1]} : vector<2x96xf32> to vector<2x32xf32>
    %97 = arith.addf %96, %12 : vector<2x32xf32>
    %98 = arith.mulf %86, %97 : vector<2x32xf32>
    %99 = arith.addf %95, %98 : vector<2x32xf32>
    %100 = math.tanh %99 : vector<2x32xf32>
    %cst_26 = arith.constant 1.000000e+00 : f32
    %101 = vector.broadcast %cst_26 : f32 to vector<2x32xf32>
    %102 = arith.subf %101, %94 : vector<2x32xf32>
    %103 = arith.mulf %102, %100 : vector<2x32xf32>
    %104 = arith.mulf %94, %74 : vector<2x32xf32>
    %105 = arith.addf %103, %104 : vector<2x32xf32>
    %c0_27 = arith.constant 0 : index
    %c64 = arith.constant 64 : index
    %106 = vector.load %arg6[%c0_27, %c64] : memref<2x256xf32, #tpu.memory_space<vmem>>, vector<2x32xf32>
    tpu.vector_store %arg6[%c0_27, %c64], %105 {strides = array<i32>} : memref<2x256xf32, #tpu.memory_space<vmem>>, vector<2x32xf32>,
    %107 = vector.extract_strided_slice %8 {offsets = [6, 0], sizes = [2, 96], strides = [1, 1]} : vector<16x96xf32> to vector<2x96xf32>
    %108 = arith.truncf %105 : vector<2x32xf32> to vector<2x32xbf16>
    %cst_28 = arith.constant dense<0.000000e+00> : vector<2x96xf32>
    %109 = tpu.matmul %108, %9, %cst_28 {dimension_numbers = #tpu.dot_dimension_numbers<[1], [0], [0], [1], [0, 0, 1, 1], [], []>} : vector<2x32xbf16>, vector<32x96xbf16>, vector<2x96xf32> -> vector<2x96xf32>
    %110 = vector.extract_strided_slice %107 {offsets = [0, 0], sizes = [2, 32], strides = [1, 1]} : vector<2x96xf32> to vector<2x32xf32>
    %111 = vector.extract_strided_slice %109 {offsets = [0, 0], sizes = [2, 32], strides = [1, 1]} : vector<2x96xf32> to vector<2x32xf32>
    %112 = arith.addf %110, %111 : vector<2x32xf32>
    %113 = arith.negf %112 : vector<2x32xf32>
    %114 = math.exp %113 : vector<2x32xf32>
    %cst_29 = arith.constant 1.000000e+00 : f32
    %115 = vector.broadcast %cst_29 : f32 to vector<2x32xf32>
    %116 = arith.addf %115, %114 : vector<2x32xf32>
    %117 = arith.divf %115, %116 : vector<2x32xf32>
    %118 = vector.extract_strided_slice %107 {offsets = [0, 32], sizes = [2, 32], strides = [1, 1]} : vector<2x96xf32> to vector<2x32xf32>
    %119 = vector.extract_strided_slice %109 {offsets = [0, 32], sizes = [2, 32], strides = [1, 1]} : vector<2x96xf32> to vector<2x32xf32>
    %120 = arith.addf %118, %119 : vector<2x32xf32>
    %121 = arith.negf %120 : vector<2x32xf32>
    %122 = math.exp %121 : vector<2x32xf32>
    %cst_30 = arith.constant 1.000000e+00 : f32
    %123 = vector.broadcast %cst_30 : f32 to vector<2x32xf32>
    %124 = arith.addf %123, %122 : vector<2x32xf32>
    %125 = arith.divf %123, %124 : vector<2x32xf32>
    %126 = vector.extract_strided_slice %107 {offsets = [0, 64], sizes = [2, 32], strides = [1, 1]} : vector<2x96xf32> to vector<2x32xf32>
    %127 = vector.extract_strided_slice %109 {offsets = [0, 64], sizes = [2, 32], strides = [1, 1]} : vector<2x96xf32> to vector<2x32xf32>
    %128 = arith.addf %127, %12 : vector<2x32xf32>
    %129 = arith.mulf %117, %128 : vector<2x32xf32>
    %130 = arith.addf %126, %129 : vector<2x32xf32>
    %131 = math.tanh %130 : vector<2x32xf32>
    %cst_31 = arith.constant 1.000000e+00 : f32
    %132 = vector.broadcast %cst_31 : f32 to vector<2x32xf32>
    %133 = arith.subf %132, %125 : vector<2x32xf32>
    %134 = arith.mulf %133, %131 : vector<2x32xf32>
    %135 = arith.mulf %125, %105 : vector<2x32xf32>
    %136 = arith.addf %134, %135 : vector<2x32xf32>
    %c0_32 = arith.constant 0 : index
    %c96 = arith.constant 96 : index
    %137 = vector.load %arg6[%c0_32, %c96] : memref<2x256xf32, #tpu.memory_space<vmem>>, vector<2x32xf32>
    tpu.vector_store %arg6[%c0_32, %c96], %136 {strides = array<i32>} : memref<2x256xf32, #tpu.memory_space<vmem>>, vector<2x32xf32>,
    %138 = vector.extract_strided_slice %8 {offsets = [8, 0], sizes = [2, 96], strides = [1, 1]} : vector<16x96xf32> to vector<2x96xf32>
    %139 = arith.truncf %136 : vector<2x32xf32> to vector<2x32xbf16>
    %cst_33 = arith.constant dense<0.000000e+00> : vector<2x96xf32>
    %140 = tpu.matmul %139, %9, %cst_33 {dimension_numbers = #tpu.dot_dimension_numbers<[1], [0], [0], [1], [0, 0, 1, 1], [], []>} : vector<2x32xbf16>, vector<32x96xbf16>, vector<2x96xf32> -> vector<2x96xf32>
    %141 = vector.extract_strided_slice %138 {offsets = [0, 0], sizes = [2, 32], strides = [1, 1]} : vector<2x96xf32> to vector<2x32xf32>
    %142 = vector.extract_strided_slice %140 {offsets = [0, 0], sizes = [2, 32], strides = [1, 1]} : vector<2x96xf32> to vector<2x32xf32>
    %143 = arith.addf %141, %142 : vector<2x32xf32>
    %144 = arith.negf %143 : vector<2x32xf32>
    %145 = math.exp %144 : vector<2x32xf32>
    %cst_34 = arith.constant 1.000000e+00 : f32
    %146 = vector.broadcast %cst_34 : f32 to vector<2x32xf32>
    %147 = arith.addf %146, %145 : vector<2x32xf32>
    %148 = arith.divf %146, %147 : vector<2x32xf32>
    %149 = vector.extract_strided_slice %138 {offsets = [0, 32], sizes = [2, 32], strides = [1, 1]} : vector<2x96xf32> to vector<2x32xf32>
    %150 = vector.extract_strided_slice %140 {offsets = [0, 32], sizes = [2, 32], strides = [1, 1]} : vector<2x96xf32> to vector<2x32xf32>
    %151 = arith.addf %149, %150 : vector<2x32xf32>
    %152 = arith.negf %151 : vector<2x32xf32>
    %153 = math.exp %152 : vector<2x32xf32>
    %cst_35 = arith.constant 1.000000e+00 : f32
    %154 = vector.broadcast %cst_35 : f32 to vector<2x32xf32>
    %155 = arith.addf %154, %153 : vector<2x32xf32>
    %156 = arith.divf %154, %155 : vector<2x32xf32>
    %157 = vector.extract_strided_slice %138 {offsets = [0, 64], sizes = [2, 32], strides = [1, 1]} : vector<2x96xf32> to vector<2x32xf32>
    %158 = vector.extract_strided_slice %140 {offsets = [0, 64], sizes = [2, 32], strides = [1, 1]} : vector<2x96xf32> to vector<2x32xf32>
    %159 = arith.addf %158, %12 : vector<2x32xf32>
    %160 = arith.mulf %148, %159 : vector<2x32xf32>
    %161 = arith.addf %157, %160 : vector<2x32xf32>
    %162 = math.tanh %161 : vector<2x32xf32>
    %cst_36 = arith.constant 1.000000e+00 : f32
    %163 = vector.broadcast %cst_36 : f32 to vector<2x32xf32>
    %164 = arith.subf %163, %156 : vector<2x32xf32>
    %165 = arith.mulf %164, %162 : vector<2x32xf32>
    %166 = arith.mulf %156, %136 : vector<2x32xf32>
    %167 = arith.addf %165, %166 : vector<2x32xf32>
    %c0_37 = arith.constant 0 : index
    %c128 = arith.constant 128 : index
    %168 = vector.load %arg6[%c0_37, %c128] : memref<2x256xf32, #tpu.memory_space<vmem>>, vector<2x32xf32>
    tpu.vector_store %arg6[%c0_37, %c128], %167 {strides = array<i32>} : memref<2x256xf32, #tpu.memory_space<vmem>>, vector<2x32xf32>,
    %169 = vector.extract_strided_slice %8 {offsets = [10, 0], sizes = [2, 96], strides = [1, 1]} : vector<16x96xf32> to vector<2x96xf32>
    %170 = arith.truncf %167 : vector<2x32xf32> to vector<2x32xbf16>
    %cst_38 = arith.constant dense<0.000000e+00> : vector<2x96xf32>
    %171 = tpu.matmul %170, %9, %cst_38 {dimension_numbers = #tpu.dot_dimension_numbers<[1], [0], [0], [1], [0, 0, 1, 1], [], []>} : vector<2x32xbf16>, vector<32x96xbf16>, vector<2x96xf32> -> vector<2x96xf32>
    %172 = vector.extract_strided_slice %169 {offsets = [0, 0], sizes = [2, 32], strides = [1, 1]} : vector<2x96xf32> to vector<2x32xf32>
    %173 = vector.extract_strided_slice %171 {offsets = [0, 0], sizes = [2, 32], strides = [1, 1]} : vector<2x96xf32> to vector<2x32xf32>
    %174 = arith.addf %172, %173 : vector<2x32xf32>
    %175 = arith.negf %174 : vector<2x32xf32>
    %176 = math.exp %175 : vector<2x32xf32>
    %cst_39 = arith.constant 1.000000e+00 : f32
    %177 = vector.broadcast %cst_39 : f32 to vector<2x32xf32>
    %178 = arith.addf %177, %176 : vector<2x32xf32>
    %179 = arith.divf %177, %178 : vector<2x32xf32>
    %180 = vector.extract_strided_slice %169 {offsets = [0, 32], sizes = [2, 32], strides = [1, 1]} : vector<2x96xf32> to vector<2x32xf32>
    %181 = vector.extract_strided_slice %171 {offsets = [0, 32], sizes = [2, 32], strides = [1, 1]} : vector<2x96xf32> to vector<2x32xf32>
    %182 = arith.addf %180, %181 : vector<2x32xf32>
    %183 = arith.negf %182 : vector<2x32xf32>
    %184 = math.exp %183 : vector<2x32xf32>
    %cst_40 = arith.constant 1.000000e+00 : f32
    %185 = vector.broadcast %cst_40 : f32 to vector<2x32xf32>
    %186 = arith.addf %185, %184 : vector<2x32xf32>
    %187 = arith.divf %185, %186 : vector<2x32xf32>
    %188 = vector.extract_strided_slice %169 {offsets = [0, 64], sizes = [2, 32], strides = [1, 1]} : vector<2x96xf32> to vector<2x32xf32>
    %189 = vector.extract_strided_slice %171 {offsets = [0, 64], sizes = [2, 32], strides = [1, 1]} : vector<2x96xf32> to vector<2x32xf32>
    %190 = arith.addf %189, %12 : vector<2x32xf32>
    %191 = arith.mulf %179, %190 : vector<2x32xf32>
    %192 = arith.addf %188, %191 : vector<2x32xf32>
    %193 = math.tanh %192 : vector<2x32xf32>
    %cst_41 = arith.constant 1.000000e+00 : f32
    %194 = vector.broadcast %cst_41 : f32 to vector<2x32xf32>
    %195 = arith.subf %194, %187 : vector<2x32xf32>
    %196 = arith.mulf %195, %193 : vector<2x32xf32>
    %197 = arith.mulf %187, %167 : vector<2x32xf32>
    %198 = arith.addf %196, %197 : vector<2x32xf32>
    %c0_42 = arith.constant 0 : index
    %c160 = arith.constant 160 : index
    %199 = vector.load %arg6[%c0_42, %c160] : memref<2x256xf32, #tpu.memory_space<vmem>>, vector<2x32xf32>
    tpu.vector_store %arg6[%c0_42, %c160], %198 {strides = array<i32>} : memref<2x256xf32, #tpu.memory_space<vmem>>, vector<2x32xf32>,
    %200 = vector.extract_strided_slice %8 {offsets = [12, 0], sizes = [2, 96], strides = [1, 1]} : vector<16x96xf32> to vector<2x96xf32>
    %201 = arith.truncf %198 : vector<2x32xf32> to vector<2x32xbf16>
    %cst_43 = arith.constant dense<0.000000e+00> : vector<2x96xf32>
    %202 = tpu.matmul %201, %9, %cst_43 {dimension_numbers = #tpu.dot_dimension_numbers<[1], [0], [0], [1], [0, 0, 1, 1], [], []>} : vector<2x32xbf16>, vector<32x96xbf16>, vector<2x96xf32> -> vector<2x96xf32>
    %203 = vector.extract_strided_slice %200 {offsets = [0, 0], sizes = [2, 32], strides = [1, 1]} : vector<2x96xf32> to vector<2x32xf32>
    %204 = vector.extract_strided_slice %202 {offsets = [0, 0], sizes = [2, 32], strides = [1, 1]} : vector<2x96xf32> to vector<2x32xf32>
    %205 = arith.addf %203, %204 : vector<2x32xf32>
    %206 = arith.negf %205 : vector<2x32xf32>
    %207 = math.exp %206 : vector<2x32xf32>
    %cst_44 = arith.constant 1.000000e+00 : f32
    %208 = vector.broadcast %cst_44 : f32 to vector<2x32xf32>
    %209 = arith.addf %208, %207 : vector<2x32xf32>
    %210 = arith.divf %208, %209 : vector<2x32xf32>
    %211 = vector.extract_strided_slice %200 {offsets = [0, 32], sizes = [2, 32], strides = [1, 1]} : vector<2x96xf32> to vector<2x32xf32>
    %212 = vector.extract_strided_slice %202 {offsets = [0, 32], sizes = [2, 32], strides = [1, 1]} : vector<2x96xf32> to vector<2x32xf32>
    %213 = arith.addf %211, %212 : vector<2x32xf32>
    %214 = arith.negf %213 : vector<2x32xf32>
    %215 = math.exp %214 : vector<2x32xf32>
    %cst_45 = arith.constant 1.000000e+00 : f32
    %216 = vector.broadcast %cst_45 : f32 to vector<2x32xf32>
    %217 = arith.addf %216, %215 : vector<2x32xf32>
    %218 = arith.divf %216, %217 : vector<2x32xf32>
    %219 = vector.extract_strided_slice %200 {offsets = [0, 64], sizes = [2, 32], strides = [1, 1]} : vector<2x96xf32> to vector<2x32xf32>
    %220 = vector.extract_strided_slice %202 {offsets = [0, 64], sizes = [2, 32], strides = [1, 1]} : vector<2x96xf32> to vector<2x32xf32>
    %221 = arith.addf %220, %12 : vector<2x32xf32>
    %222 = arith.mulf %210, %221 : vector<2x32xf32>
    %223 = arith.addf %219, %222 : vector<2x32xf32>
    %224 = math.tanh %223 : vector<2x32xf32>
    %cst_46 = arith.constant 1.000000e+00 : f32
    %225 = vector.broadcast %cst_46 : f32 to vector<2x32xf32>
    %226 = arith.subf %225, %218 : vector<2x32xf32>
    %227 = arith.mulf %226, %224 : vector<2x32xf32>
    %228 = arith.mulf %218, %198 : vector<2x32xf32>
    %229 = arith.addf %227, %228 : vector<2x32xf32>
    %c0_47 = arith.constant 0 : index
    %c192 = arith.constant 192 : index
    %230 = vector.load %arg6[%c0_47, %c192] : memref<2x256xf32, #tpu.memory_space<vmem>>, vector<2x32xf32>
    tpu.vector_store %arg6[%c0_47, %c192], %229 {strides = array<i32>} : memref<2x256xf32, #tpu.memory_space<vmem>>, vector<2x32xf32>,
    %231 = vector.extract_strided_slice %8 {offsets = [14, 0], sizes = [2, 96], strides = [1, 1]} : vector<16x96xf32> to vector<2x96xf32>
    %232 = arith.truncf %229 : vector<2x32xf32> to vector<2x32xbf16>
    %cst_48 = arith.constant dense<0.000000e+00> : vector<2x96xf32>
    %233 = tpu.matmul %232, %9, %cst_48 {dimension_numbers = #tpu.dot_dimension_numbers<[1], [0], [0], [1], [0, 0, 1, 1], [], []>} : vector<2x32xbf16>, vector<32x96xbf16>, vector<2x96xf32> -> vector<2x96xf32>
    %234 = vector.extract_strided_slice %231 {offsets = [0, 0], sizes = [2, 32], strides = [1, 1]} : vector<2x96xf32> to vector<2x32xf32>
    %235 = vector.extract_strided_slice %233 {offsets = [0, 0], sizes = [2, 32], strides = [1, 1]} : vector<2x96xf32> to vector<2x32xf32>
    %236 = arith.addf %234, %235 : vector<2x32xf32>
    %237 = arith.negf %236 : vector<2x32xf32>
    %238 = math.exp %237 : vector<2x32xf32>
    %cst_49 = arith.constant 1.000000e+00 : f32
    %239 = vector.broadcast %cst_49 : f32 to vector<2x32xf32>
    %240 = arith.addf %239, %238 : vector<2x32xf32>
    %241 = arith.divf %239, %240 : vector<2x32xf32>
    %242 = vector.extract_strided_slice %231 {offsets = [0, 32], sizes = [2, 32], strides = [1, 1]} : vector<2x96xf32> to vector<2x32xf32>
    %243 = vector.extract_strided_slice %233 {offsets = [0, 32], sizes = [2, 32], strides = [1, 1]} : vector<2x96xf32> to vector<2x32xf32>
    %244 = arith.addf %242, %243 : vector<2x32xf32>
    %245 = arith.negf %244 : vector<2x32xf32>
    %246 = math.exp %245 : vector<2x32xf32>
    %cst_50 = arith.constant 1.000000e+00 : f32
    %247 = vector.broadcast %cst_50 : f32 to vector<2x32xf32>
    %248 = arith.addf %247, %246 : vector<2x32xf32>
    %249 = arith.divf %247, %248 : vector<2x32xf32>
    %250 = vector.extract_strided_slice %231 {offsets = [0, 64], sizes = [2, 32], strides = [1, 1]} : vector<2x96xf32> to vector<2x32xf32>
    %251 = vector.extract_strided_slice %233 {offsets = [0, 64], sizes = [2, 32], strides = [1, 1]} : vector<2x96xf32> to vector<2x32xf32>
    %252 = arith.addf %251, %12 : vector<2x32xf32>
    %253 = arith.mulf %241, %252 : vector<2x32xf32>
    %254 = arith.addf %250, %253 : vector<2x32xf32>
    %255 = math.tanh %254 : vector<2x32xf32>
    %cst_51 = arith.constant 1.000000e+00 : f32
    %256 = vector.broadcast %cst_51 : f32 to vector<2x32xf32>
    %257 = arith.subf %256, %249 : vector<2x32xf32>
    %258 = arith.mulf %257, %255 : vector<2x32xf32>
    %259 = arith.mulf %249, %229 : vector<2x32xf32>
    %260 = arith.addf %258, %259 : vector<2x32xf32>
    %c0_52 = arith.constant 0 : index
    %c224 = arith.constant 224 : index
    %261 = vector.load %arg6[%c0_52, %c224] : memref<2x256xf32, #tpu.memory_space<vmem>>, vector<2x32xf32>
    tpu.vector_store %arg6[%c0_52, %c224], %260 {strides = array<i32>} : memref<2x256xf32, #tpu.memory_space<vmem>>, vector<2x32xf32>,
    %c0_53 = arith.constant 0 : index
    %c0_54 = arith.constant 0 : index
    %262 = vector.load %arg7[%c0_53, %c0_54] : memref<2x32xf32, #tpu.memory_space<vmem>>, vector<2x32xf32>
    tpu.vector_store %arg7[%c0_53, %c0_54], %260 {strides = array<i32>} : memref<2x32xf32, #tpu.memory_space<vmem>>, vector<2x32xf32>,
    return
  }
  func.func @transform_0(%arg0: i32) -> (i32, i32) {
    %c0_i32 = arith.constant 0 : i32
    %c0_i32_0 = arith.constant 0 : i32
    return %arg0, %c0_i32 : i32, i32
  }
  func.func @transform_1(%arg0: i32) -> (i32, i32) {
    %c0_i32 = arith.constant 0 : i32
    %c0_i32_0 = arith.constant 0 : i32
    %c0_i32_1 = arith.constant 0 : i32
    return %c0_i32, %c0_i32_0 : i32, i32
  }
  func.func @transform_2(%arg0: i32) -> (i32, i32) {
    %c0_i32 = arith.constant 0 : i32
    %c0_i32_0 = arith.constant 0 : i32
    %c0_i32_1 = arith.constant 0 : i32
    return %c0_i32, %c0_i32_0 : i32, i32
  }
  func.func @transform_3(%arg0: i32) -> (i32, i32) {
    %c0_i32 = arith.constant 0 : i32
    %c0_i32_0 = arith.constant 0 : i32
    %c0_i32_1 = arith.constant 0 : i32
    return %c0_i32, %c0_i32_0 : i32, i32
  }
  func.func @transform_4(%arg0: i32) -> (i32, i32) {
    %c0_i32 = arith.constant 0 : i32
    %c0_i32_0 = arith.constant 0 : i32
    %c0_i32_1 = arith.constant 0 : i32
    return %c0_i32, %c0_i32_0 : i32, i32
  }
  func.func @transform_5(%arg0: i32) -> (i32, i32) {
    %c0_i32 = arith.constant 0 : i32
    %c0_i32_0 = arith.constant 0 : i32
    return %c0_i32, %arg0 : i32, i32
  }
}

</mosaic_0001>

<bundles_post_ra>
// kernel: encoder_forward.1
= control target key start
LH: loop header
LB: loop body
LE: loop exit
PB: predicated region body
PF: predicated region fallthrough
CT: control target
= control target key end

     0   :  { %vm46_vm0 = vcmask 1041408   ;;  %v1042_v0 = vmov 0.0   ;;  %vm25_vm1 = vcmask 254976   ;;  %vm1043_vm2 = vmmov 0   ;;  %s1044_s27 = smov 64   ;;  %s1308_s2 = inlined_call_operand.vmem [shape: bf16[32,96], index: 2, kind: input, shape index: {}]   ;;  %s1309_s1 = inlined_call_operand.vmem [shape: bf16[4,96], index: 1, kind: input, shape index: {}]   ;;  %s1310_s0 = inlined_call_operand.vmem [shape: bf16[16,4], index: 0, kind: input, shape index: {}]   ;;  %s1311_s4 = inlined_call_operand.vmem [shape: f32[1,32], index: 4, kind: input, shape index: {}]   ;;  %s1312_s3 = inlined_call_operand.vmem [shape: f32[1,96], index: 3, kind: input, shape index: {}]   ;;  %s1313_s5 = inlined_call_operand.vmem [shape: f32[2,256], index: 5, kind: output, shape index: {}]  }
   0x1   :  { %921 = vmatprep.subr.bf16.mxu1 %v1042_v0  ;;  %v1082_v1 = vld [vmem:[%s1308_s2] sm:$0xff]   ;;  %915 = vmatprep.subr.bf16.mxu0 %v1042_v0  ;;  %26 = vst.msk [vmem:[#allocation2] sm:$0x3] %vm25_vm1, %v1042_v0  ;;  %v1098_v4 = vld [vmem:[%s1308_s2 + $0x8] sm:$0xff]   ;;  %vm42_vm3 = vcmask 31744   ;;  %vm115_vm4 = vcmask 261120  }
   0x2   :  { %v29_v2 = vld [vmem:[%s1309_s1] sm:$0x3]  ;;  %917 = vmatprep.mubr.msk.bf16.mxu0 %vm1043_vm2, %v1042_v0  ;;  %925 = vmatprep.mubr.msk.bf16.mxu1 %vm1043_vm2, %v1042_v0  ;;  %vm296_vm5 = vcmask 517376   ;;  %vm391_vm6 = vcmask 779776   ;;  %vm487_vm7 = vcmask 1042176   ;;  %vm861_vm8 = vcmask 261126  }
   0x3   :  { %922 = vmatpush3.bf16.msra.mxu1 %v1082_v1  ;;  %v48_v3 = vsel %vm46_vm0, %v29_v2, 0  ;;  %v993_v5 = vld [vmem:[%s1310_s0] sm:$0xff]  }
   0x4   :  { %916 = vmatpush3.bf16.msra.mxu0 %v48_v3  ;;  %923 = vmatprep.subr.bf16.mxu1 %v1042_v0  ;;  %v870_v6 = vld [vmem:[%s1311_s4] ss:$0 sm:$0xff]  ;;  %s1045_s4 = smov 32  }
   0x5   :  { %166 = vrot.lane.b32.xlu0 %v870_v6, %s1044_s27  ;;  %929 = vmatprep.subr.bf16.mxu0 %v1042_v0  ;;  %v867_v11 = vld [vmem:[%s1312_s3] ss:$0 sm:$0xff]  ;;  %s1046_s3 = smov 96  }
   0x7   :  { %924 = vmatpush3.bf16.msra.mxu1 %v1098_v4  ;;  %918 = vmatmul.mubr.msk.bf16.vlgmr.msra.gmra.mrb[0].mxu0 %vm42_vm3, %v993_v5 }
   0x8   :  { %930 = vmatpush3.bf16.msra.mxu0 %v1082_v1  ;;  %933 = vmatprep.mubr.msk.bf16.mxu0 %vm1043_vm2, %v1042_v0  ;;  %v101_v7 = vld [vmem:[#allocation2] sm:$0x3] }
   0x9   :  { %931 = vmatprep.subr.bf16.mxu0 %v1042_v0  ;;  %937 = vmatprep.subr.bf16.mxu1 %v1042_v0  ;;  %v102_v8 = vpack.c.bf16 %v101_v7, %v101_v7 }
   0xb   :  { %926 = vmatmul.mubr.msk.bf16.vlgmr.msra.gmra.mrb[0].mxu1 %vm115_vm4, %v102_v8 }
   0xc   :  { %932 = vmatpush3.bf16.msra.mxu0 %v1098_v4  ;;  %938 = vmatpush3.bf16.msra.mxu1 %v1082_v1 }
   0xd   :  { %941 = vmatprep.mubr.msk.bf16.mxu1 %vm1043_vm2, %v1042_v0  ;;  %939 = vmatprep.subr.bf16.mxu1 %v1042_v0 }
   0xe   :  { %945 = vmatprep.subr.bf16.mxu0 %v1042_v0 }
  0x10   :  { %940 = vmatpush3.bf16.msra.mxu1 %v1098_v4 }
  0x11   :  { %953 = vmatprep.subr.bf16.mxu1 %v1042_v0 }
  0x77   :  { %v1127_v13 = vpop.permute.xlu0 %166 }
  0xda   :  { %v84_v9 = vpop.f32.mrb[0].mxu0 }
  0xdb   :  { %v919_v10 = vpop.f32.mrb[1].mxu0  ;;  %v1134_v21 = vadd.f32 %v867_v11, %v84_v9 }
  0xdc   :  { %v87_v12 = vpop.f32.mrb[2].mxu0 }
  0xdd   :  { %v1129_v14 = vadd.f32 %v867_v11, %v87_v12  ;;  %v920_v15 = vpop.f32.mrb[3].mxu0 }
  0xde   :  { %v153_v16 = vpop.f32.mrb[0].mxu1 }
  0xdf   :  { %v169_v17 = vadd.f32 %v1127_v13, %v153_v16  ;;  %v927_v18 = vpop.f32.mrb[1].mxu1  ;;  %v159_v22 = vadd.f32 %v153_v16, %v1134_v21 }
  0xe0   :  { %v156_v19 = vpop.f32.mrb[2].mxu1 }
  0xe1   :  { %171 = vrot.lane.b32.xlu0 %v169_v17, %s1044_s27  ;;  %v928_v20 = vpop.f32.mrb[3].mxu1  ;;  %v874_v23 = vmul.f32 -1.442695, %v159_v22 }
  0xe3   :  { %994 = vpow2.f32 %v874_v23 }
  0xe5   :  { %188 = vrot.lane.b32.xlu0 %v101_v7, %s1045_s4 }
  0xed   :  { %v995_v24 = vpop.eup %994 }
  0xee   :  { %v163_v25 = vadd.f32 1.0, %v995_v24 }
  0xf0   :  { %996 = vrcp.f32 %v163_v25 }
  0xfa   :  { %v997_v26 = vpop.eup %996 }
  0xfb   :  { %v181_v33 = vsub.f32 1.0, %v997_v26 }
 0x153   :  { %v172_v27 = vpop.permute.xlu0 %171 }
 0x154   :  { %v174_v28 = vmul.f32 %v997_v26, %v172_v27 }
 0x156   :  { %176 = vrot.lane.b32.xlu1 %v174_v28, %s1044_s27 }
 0x157   :  { %v189_v32 = vpop.permute.xlu0 %188 }
 0x158   :  { %v191_v35 = vmul.f32 %v997_v26, %v189_v32 }
 0x1c8   :  { %v177_v29 = vpop.permute.xlu1 %176 }
 0x1c9   :  { %v179_v30 = vadd.f32 %v177_v29, %v1134_v21 }
 0x1cb   :  { %998 = vtanh.f32 %v179_v30 }
 0x1d5   :  { %v999_v31 = vpop.eup %998 }
 0x1d6   :  { %183 = vrot.lane.b32.xlu1 %v999_v31, %s1046_s3 }
 0x248   :  { %v184_v34 = vpop.permute.xlu1 %183 }
 0x249   :  { %v186_v36 = vmul.f32 %v184_v34, %v181_v33 }
 0x24b   :  { %v1140_v37 = vadd.f32 %v191_v35, %v186_v36 }
 0x24d   :  { %v206_v38 = vpack.c.bf16 %v1140_v37, %v1140_v37  ;;  %v282_v58 = vrot.slane %v1140_v37, 6 }
 0x24f   :  { %208 = vrot.lane.b32.xlu1 %v206_v38, %s1046_s3 }
 0x2c1   :  { %v209_v39 = vpop.permute.xlu1 %208 }
 0x2c2   :  { %934 = vmatmul.mubr.msk.bf16.vlgmr.msra.gmra.mrb[4].mxu0 %vm115_vm4, %v209_v39 }
 0x2c3   :  { %946 = vmatpush3.bf16.msra.mxu0 %v1082_v1  ;;  %949 = vmatprep.mubr.msk.bf16.mxu0 %vm1043_vm2, %v1042_v0 }
 0x2c4   :  { %947 = vmatprep.subr.bf16.mxu0 %v1042_v0 }
 0x2c7   :  { %948 = vmatpush3.bf16.msra.mxu0 %v1098_v4 }
 0x2c8   :  { %961 = vmatprep.subr.bf16.mxu0 %v1042_v0 }
 0x395   :  { %v247_v40 = vpop.f32.mrb[4].mxu0 }
 0x396   :  { %v263_v41 = vadd.f32 %v247_v40, %v1127_v13  ;;  %v935_v42 = vpop.f32.mrb[5].mxu0  ;;  %v254_v46 = vrot.slane %v247_v40, 6 }
 0x397   :  { %v250_v43 = vpop.f32.mrb[6].mxu0 }
 0x398   :  { %v265_v44 = vrot.slane %v263_v41, 6  ;;  %v936_v45 = vpop.f32.mrb[7].mxu0  ;;  %v256_v47 = vadd.f32 %v254_v46, %v1134_v21 }
 0x39a   :  { %266 = vrot.lane.b32.xlu0 %v265_v44, %s1044_s27  ;;  %v876_v48 = vmul.f32 -1.442695, %v256_v47 }
 0x39c   :  { %1000 = vpow2.f32 %v876_v48 }
 0x3a6   :  { %v1001_v49 = vpop.eup %1000 }
 0x3a7   :  { %v260_v50 = vadd.f32 1.0, %v1001_v49 }
 0x3a9   :  { %1002 = vrcp.f32 %v260_v50 }
 0x3b3   :  { %v1003_v51 = vpop.eup %1002 }
 0x3b4   :  { %v276_v57 = vsub.f32 1.0, %v1003_v51  ;;  %v284_v60 = vmul.f32 %v1003_v51, %v282_v58 }
 0x40c   :  { %v267_v52 = vpop.permute.xlu0 %266 }
 0x40d   :  { %v269_v53 = vmul.f32 %v1003_v51, %v267_v52 }
 0x40f   :  { %271 = vrot.lane.b32.xlu1 %v269_v53, %s1044_s27 }
 0x481   :  { %v272_v54 = vpop.permute.xlu1 %271 }
 0x482   :  { %v274_v55 = vadd.f32 %v272_v54, %v1134_v21 }
 0x484   :  { %1004 = vtanh.f32 %v274_v55 }
 0x48e   :  { %v1005_v56 = vpop.eup %1004 }
 0x48f   :  { %278 = vrot.lane.b32.xlu0 %v1005_v56, %s1046_s3 }
 0x501   :  { %v279_v59 = vpop.permute.xlu0 %278 }
 0x502   :  { %v281_v61 = vmul.f32 %v279_v59, %v276_v57 }
 0x504   :  { %v1159_v62 = vadd.f32 %v284_v60, %v281_v61 }
 0x506   :  { %v298_v63 = vpack.c.bf16 %v1159_v62, %v1159_v62  ;;  %v375_v26 = vrot.slane %v1159_v62, 6 }
 0x508   :  { %v300_v2 = vrot.slane %v298_v63, 1 }
 0x50a   :  { %301 = vrot.lane.b32.xlu1 %v300_v2, %s1046_s3 }
 0x57c   :  { %v302_v3 = vpop.permute.xlu1 %301 }
 0x57d   :  { %942 = vmatmul.mubr.msk.bf16.vlgmr.msra.gmra.mrb[4].mxu1 %vm115_vm4, %v302_v3 }
 0x57e   :  { %954 = vmatpush3.bf16.msra.mxu1 %v1082_v1  ;;  %957 = vmatprep.mubr.msk.bf16.mxu1 %vm1043_vm2, %v1042_v0 }
 0x57f   :  { %955 = vmatprep.subr.bf16.mxu1 %v1042_v0 }
 0x582   :  { %956 = vmatpush3.bf16.msra.mxu1 %v1098_v4 }
 0x583   :  { %969 = vmatprep.subr.bf16.mxu1 %v1042_v0 }
 0x650   :  { %v340_v5 = vpop.f32.mrb[4].mxu1 }
 0x651   :  { %v356_v6 = vadd.f32 %v340_v5, %v1127_v13  ;;  %v943_v7 = vpop.f32.mrb[5].mxu1  ;;  %v347_v11 = vrot.slane %v340_v5, 4 }
 0x652   :  { %v343_v8 = vpop.f32.mrb[6].mxu1 }
 0x653   :  { %v358_v9 = vrot.slane %v356_v6, 4  ;;  %v944_v10 = vpop.f32.mrb[7].mxu1  ;;  %v349_v12 = vadd.f32 %v347_v11, %v1134_v21 }
 0x655   :  { %359 = vrot.lane.b32.xlu0 %v358_v9, %s1044_s27  ;;  %v878_v15 = vmul.f32 -1.442695, %v349_v12 }
 0x657   :  { %1006 = vpow2.f32 %v878_v15 }
 0x661   :  { %v1007_v16 = vpop.eup %1006 }
 0x662   :  { %v353_v17 = vadd.f32 1.0, %v1007_v16 }
 0x664   :  { %1008 = vrcp.f32 %v353_v17 }
 0x66e   :  { %v1009_v18 = vpop.eup %1008 }
 0x66f   :  { %v369_v25 = vsub.f32 1.0, %v1009_v18  ;;  %v377_v28 = vmul.f32 %v1009_v18, %v375_v26 }
 0x6c7   :  { %v360_v19 = vpop.permute.xlu0 %359 }
 0x6c8   :  { %v362_v20 = vmul.f32 %v1009_v18, %v360_v19 }
 0x6ca   :  { %364 = vrot.lane.b32.xlu1 %v362_v20, %s1044_s27 }
 0x73c   :  { %v365_v22 = vpop.permute.xlu1 %364 }
 0x73d   :  { %v367_v23 = vadd.f32 %v365_v22, %v1134_v21 }
 0x73f   :  { %1010 = vtanh.f32 %v367_v23 }
 0x749   :  { %v1011_v24 = vpop.eup %1010 }
 0x74a   :  { %371 = vrot.lane.b32.xlu0 %v1011_v24, %s1046_s3 }
 0x7bc   :  { %v372_v27 = vpop.permute.xlu0 %371 }
 0x7bd   :  { %v374_v29 = vmul.f32 %v372_v27, %v369_v25 }
 0x7bf   :  { %v1178_v30 = vadd.f32 %v377_v28, %v374_v29 }
 0x7c1   :  { %v393_v31 = vpack.c.bf16 %v1178_v30, %v1178_v30  ;;  %v470_v53 = vrot.slane %v1178_v30, 6 }
 0x7c3   :  { %v395_v32 = vrot.slane %v393_v31, 2 }
 0x7c5   :  { %396 = vrot.lane.b32.xlu1 %v395_v32, %s1046_s3 }
 0x837   :  { %v397_v33 = vpop.permute.xlu1 %396 }
 0x838   :  { %950 = vmatmul.mubr.msk.bf16.vlgmr.msra.gmra.mrb[8].mxu0 %vm115_vm4, %v397_v33 }
 0x839   :  { %962 = vmatpush3.bf16.msra.mxu0 %v1082_v1  ;;  %965 = vmatprep.mubr.msk.bf16.mxu0 %vm1043_vm2, %v1042_v0 }
 0x83a   :  { %963 = vmatprep.subr.bf16.mxu0 %v1042_v0 }
 0x83d   :  { %964 = vmatpush3.bf16.msra.mxu0 %v1098_v4 }
 0x83e   :  { %977 = vmatprep.subr.bf16.mxu0 %v1042_v0 }
 0x90b   :  { %v435_v34 = vpop.f32.mrb[8].mxu0 }
 0x90c   :  { %v451_v35 = vadd.f32 %v435_v34, %v1127_v13  ;;  %v951_v36 = vpop.f32.mrb[9].mxu0  ;;  %v442_v41 = vrot.slane %v435_v34, 2 }
 0x90d   :  { %v438_v38 = vpop.f32.mrb[10].mxu0 }
 0x90e   :  { %v453_v39 = vrot.slane %v451_v35, 2  ;;  %v952_v40 = vpop.f32.mrb[11].mxu0  ;;  %v444_v42 = vadd.f32 %v442_v41, %v1134_v21 }
 0x910   :  { %454 = vrot.lane.b32.xlu0 %v453_v39, %s1044_s27  ;;  %v880_v43 = vmul.f32 -1.442695, %v444_v42 }
 0x912   :  { %1012 = vpow2.f32 %v880_v43 }
 0x91c   :  { %v1013_v44 = vpop.eup %1012 }
 0x91d   :  { %v448_v45 = vadd.f32 1.0, %v1013_v44 }
 0x91f   :  { %1014 = vrcp.f32 %v448_v45 }
 0x929   :  { %v1015_v46 = vpop.eup %1014 }
 0x92a   :  { %v464_v52 = vsub.f32 1.0, %v1015_v46  ;;  %v472_v55 = vmul.f32 %v1015_v46, %v470_v53 }
 0x982   :  { %v455_v47 = vpop.permute.xlu0 %454 }
 0x983   :  { %v457_v48 = vmul.f32 %v1015_v46, %v455_v47 }
 0x985   :  { %459 = vrot.lane.b32.xlu1 %v457_v48, %s1044_s27 }
 0x9f7   :  { %v460_v49 = vpop.permute.xlu1 %459 }
 0x9f8   :  { %v462_v50 = vadd.f32 %v460_v49, %v1134_v21 }
 0x9fa   :  { %1016 = vtanh.f32 %v462_v50 }
 0xa04   :  { %v1017_v51 = vpop.eup %1016 }
 0xa05   :  { %466 = vrot.lane.b32.xlu0 %v1017_v51, %s1046_s3 }
 0xa77   :  { %v467_v54 = vpop.permute.xlu0 %466 }
 0xa78   :  { %v469_v56 = vmul.f32 %v467_v54, %v464_v52 }
 0xa7a   :  { %v1197_v57 = vadd.f32 %v472_v55, %v469_v56 }
 0xa7c   :  { %v489_v58 = vpack.c.bf16 %v1197_v57, %v1197_v57  ;;  %v562_v18 = vrot.slane %v1197_v57, 6 }
 0xa7e   :  { %v491_v59 = vrot.slane %v489_v58, 3 }
 0xa80   :  { %492 = vrot.lane.b32.xlu1 %v491_v59, %s1046_s3 }
 0xaf2   :  { %v493_v60 = vpop.permute.xlu1 %492 }
 0xaf3   :  { %958 = vmatmul.mubr.msk.bf16.vlgmr.msra.gmra.mrb[8].mxu1 %vm115_vm4, %v493_v60 }
 0xaf4   :  { %970 = vmatpush3.bf16.msra.mxu1 %v1082_v1  ;;  %973 = vmatprep.mubr.msk.bf16.mxu1 %vm1043_vm2, %v1042_v0 }
 0xaf5   :  { %971 = vmatprep.subr.bf16.mxu1 %v1042_v0 }
 0xaf8   :  { %972 = vmatpush3.bf16.msra.mxu1 %v1098_v4 }
 0xbc6   :  { %v531_v21 = vpop.f32.mrb[8].mxu1 }
 0xbc7   :  { %v544_v61 = vadd.f32 %v531_v21, %v1127_v13  ;;  %v959_v63 = vpop.f32.mrb[9].mxu1  ;;  %v537_v5 = vadd.f32 %v531_v21, %v1129_v14 }
 0xbc8   :  { %v534_v2 = vpop.f32.mrb[10].mxu1 }
 0xbc9   :  { %546 = vrot.lane.b32.xlu0 %v544_v61, %s1044_s27  ;;  %v960_v3 = vpop.f32.mrb[11].mxu1  ;;  %v882_v6 = vmul.f32 -1.442695, %v537_v5 }
 0xbcb   :  { %1018 = vpow2.f32 %v882_v6 }
 0xbd5   :  { %v1019_v7 = vpop.eup %1018 }
 0xbd6   :  { %v541_v8 = vadd.f32 1.0, %v1019_v7 }
 0xbd8   :  { %1020 = vrcp.f32 %v541_v8 }
 0xbe2   :  { %v1021_v9 = vpop.eup %1020 }
 0xbe3   :  { %v556_v17 = vsub.f32 1.0, %v1021_v9  ;;  %v564_v20 = vmul.f32 %v1021_v9, %v562_v18 }
 0xc3b   :  { %v547_v10 = vpop.permute.xlu0 %546 }
 0xc3c   :  { %v549_v11 = vmul.f32 %v1021_v9, %v547_v10 }
 0xc3e   :  { %551 = vrot.lane.b32.xlu1 %v549_v11, %s1044_s27 }
 0xcb0   :  { %v552_v12 = vpop.permute.xlu1 %551 }
 0xcb1   :  { %v554_v15 = vadd.f32 %v552_v12, %v1129_v14 }
 0xcb3   :  { %1022 = vtanh.f32 %v554_v15 }
 0xcbd   :  { %v1023_v16 = vpop.eup %1022 }
 0xcbe   :  { %558 = vrot.lane.b32.xlu0 %v1023_v16, %s1046_s3 }
 0xd30   :  { %v559_v19 = vpop.permute.xlu0 %558 }
 0xd31   :  { %v561_v22 = vmul.f32 %v559_v19, %v556_v17 }
 0xd33   :  { %v1215_v23 = vadd.f32 %v564_v20, %v561_v22 }
 0xd35   :  { %v578_v24 = vpack.c.bf16 %v1215_v23, %v1215_v23  ;;  %v654_v43 = vrot.slane %v1215_v23, 6 }
 0xd37   :  { %580 = vrot.lane.b32.xlu1 %v578_v24, %s1046_s3 }
 0xda9   :  { %v581_v25 = vpop.permute.xlu1 %580 }
 0xdaa   :  { %966 = vmatmul.mubr.msk.bf16.vlgmr.msra.gmra.mrb[12].mxu0 %vm115_vm4, %v581_v25 }
 0xdab   :  { %978 = vmatpush3.bf16.msra.mxu0 %v1082_v1  ;;  %981 = vmatprep.mubr.msk.bf16.mxu0 %vm1043_vm2, %v1042_v0 }
 0xdac   :  { %979 = vmatprep.subr.bf16.mxu0 %v1042_v0 }
 0xdaf   :  { %980 = vmatpush3.bf16.msra.mxu0 %v1098_v4 }
 0xe7d   :  { %v619_v26 = vpop.f32.mrb[12].mxu0 }
 0xe7e   :  { %v635_v27 = vadd.f32 %v619_v26, %v1127_v13  ;;  %v967_v28 = vpop.f32.mrb[13].mxu0  ;;  %v626_v33 = vrot.slane %v619_v26, 6 }
 0xe7f   :  { %v622_v29 = vpop.f32.mrb[14].mxu0 }
 0xe80   :  { %v637_v31 = vrot.slane %v635_v27, 6  ;;  %v968_v32 = vpop.f32.mrb[15].mxu0  ;;  %v628_v34 = vadd.f32 %v626_v33, %v1129_v14  ;;  %v1047_v33 = vmov 1983009808  }
 0xe82   :  { %638 = vrot.lane.b32.xlu0 %v637_v31, %s1044_s27  ;;  %v884_v1 = vmul.f32 -1.442695, %v628_v34  ;;  %v195_v34 = vunpack.c.l.s4 %v1047_v33 }
 0xe84   :  { %1024 = vpow2.f32 %v884_v1  ;;  %v197_v1 = vlaneseq }
 0xe8e   :  { %v1025_v35 = vpop.eup %1024 }
 0xe8f   :  { %v632_v36 = vadd.f32 1.0, %v1025_v35  ;;  %v196_v35 = vunpack.c.0.s8 %v195_v34 }
 0xe91   :  { %1026 = vrcp.f32 %v632_v36  ;;  %v198_v36 = vshrl.u32 %v197_v1, 7 }
 0xe9b   :  { %v1027_v0 = vpop.eup %1026 }
 0xe9c   :  { %v648_v42 = vsub.f32 1.0, %v1027_v0  ;;  %v656_v45 = vmul.f32 %v1027_v0, %v654_v43 }
 0xef4   :  { %v639_v38 = vpop.permute.xlu0 %638 }
 0xef5   :  { %v641_v4 = vmul.f32 %v1027_v0, %v639_v38  ;;  %v199_v38 = vsub.s32 %v196_v35, %v198_v36 }
 0xef7   :  { %643 = vrot.lane.b32.xlu1 %v641_v4, %s1044_s27 }
 0xf69   :  { %v644_v39 = vpop.permute.xlu1 %643 }
 0xf6a   :  { %v646_v40 = vadd.f32 %v644_v39, %v1129_v14  ;;  %v200_v39 = vrot.slane %v1140_v37, %v199_v38 }
 0xf6c   :  { %1028 = vtanh.f32 %v646_v40  ;;  %v380_v40 = vcombine.high %v1178_v30, %v1178_v30 }
 0xf76   :  { %v1029_v41 = vpop.eup %1028 }
 0xf77   :  { %650 = vrot.lane.b32.xlu0 %v1029_v41, %s1046_s3  ;;  %v475_v41 = vcombine.high %v1197_v57, %v1197_v57 }
 0xf79   :  { %v482_v43 = vrot.slane %v475_v41, %v199_v38 }
 0xfe9   :  { %v651_v44 = vpop.permute.xlu0 %650 }
 0xfea   :  { %v653_v46 = vmul.f32 %v651_v44, %v648_v42  ;;  %v387_v42 = vrot.slane %v380_v40, %v199_v38  ;;  %v483_v44 = vcombine.high %v482_v43, %v482_v43 }
 0xfec   :  { %v1233_v47 = vadd.f32 %v656_v45, %v653_v46  ;;  %v293_v45 = vrot.slane %v1159_v62, %v199_v38 }
 0xfee   :  { %v669_v48 = vpack.c.bf16 %v1233_v47, %v1233_v47  ;;  %v746_v9 = vrot.slane %v1233_v47, 6  ;;  %v294_v30 = vcombine.high %v293_v45, %v293_v45 }
 0xff0   :  { %v671_v49 = vrot.slane %v669_v48, 1 }
 0xff2   :  { %672 = vrot.lane.b32.xlu1 %v671_v49, %s1046_s3  ;;  %v573_v49 = vrot.slane %v1215_v23, %v199_v38 }
0x1064   :  { %v673_v50 = vpop.permute.xlu1 %672 }
0x1065   :  { %974 = vmatmul.mubr.msk.bf16.vlgmr.msra.gmra.mrb[12].mxu1 %vm115_vm4, %v673_v50 }
0x1138   :  { %v711_v51 = vpop.f32.mrb[12].mxu1 }
0x1139   :  { %v727_v52 = vadd.f32 %v711_v51, %v1127_v13  ;;  %v975_v53 = vpop.f32.mrb[13].mxu1  ;;  %v718_v58 = vrot.slane %v711_v51, 4 }
0x113a   :  { %v714_v54 = vpop.f32.mrb[14].mxu1 }
0x113b   :  { %v729_v55 = vrot.slane %v727_v52, 4  ;;  %v976_v56 = vpop.f32.mrb[15].mxu1  ;;  %v720_v59 = vadd.f32 %v718_v58, %v1129_v14  ;;  %v665_v54 = vrot.slane %v1233_v47, %v199_v38 }
0x113d   :  { %730 = vrot.lane.b32.xlu0 %v729_v55, %s1044_s27  ;;  %v886_v60 = vmul.f32 -1.442695, %v720_v59 }
0x113f   :  { %1030 = vpow2.f32 %v886_v60  ;;  %v666_v60 = vcombine.high %v665_v54, %v665_v54 }
0x1149   :  { %v1031_v21 = vpop.eup %1030 }
0x114a   :  { %v724_v61 = vadd.f32 1.0, %v1031_v21 }
0x114c   :  { %1032 = vrcp.f32 %v724_v61 }
0x1156   :  { %v1033_v63 = vpop.eup %1032 }
0x1157   :  { %v740_v8 = vsub.f32 1.0, %v1033_v63  ;;  %v748_v11 = vmul.f32 %v1033_v63, %v746_v9 }
0x11af   :  { %v731_v2 = vpop.permute.xlu0 %730 }
0x11b0   :  { %v733_v3 = vmul.f32 %v1033_v63, %v731_v2 }
0x11b2   :  { %735 = vrot.lane.b32.xlu1 %v733_v3, %s1044_s27 }
0x1224   :  { %v736_v5 = vpop.permute.xlu1 %735 }
0x1225   :  { %v738_v6 = vadd.f32 %v736_v5, %v1129_v14 }
0x1227   :  { %1034 = vtanh.f32 %v738_v6 }
0x1231   :  { %v1035_v7 = vpop.eup %1034 }
0x1232   :  { %742 = vrot.lane.b32.xlu0 %v1035_v7, %s1046_s3 }
0x12a4   :  { %v743_v10 = vpop.permute.xlu0 %742 }
0x12a5   :  { %v745_v12 = vmul.f32 %v743_v10, %v740_v8 }
0x12a7   :  { %v1246_v15 = vadd.f32 %v748_v11, %v745_v12 }
0x12a9   :  { %v763_v16 = vpack.c.bf16 %v1246_v15, %v1246_v15  ;;  %v751_v50 = vcombine.high %v1246_v15, %v1246_v15  ;;  %v840_v53 = vrot.slane %v1246_v15, 6 }
0x12ab   :  { %v765_v17 = vrot.slane %v763_v16, 2  ;;  %v758_v51 = vrot.slane %v751_v50, %v199_v38 }
0x12ad   :  { %766 = vrot.lane.b32.xlu1 %v765_v17, %s1046_s3 }
0x131f   :  { %v767_v18 = vpop.permute.xlu1 %766 }
0x1320   :  { %982 = vmatmul.mubr.msk.bf16.vlgmr.msra.gmra.mrb[16].mxu0 %vm115_vm4, %v767_v18 }
0x13f3   :  { %v805_v19 = vpop.f32.mrb[16].mxu0 }
0x13f4   :  { %v821_v20 = vadd.f32 %v805_v19, %v1127_v13  ;;  %v983_v22 = vpop.f32.mrb[17].mxu0  ;;  %v812_v27 = vrot.slane %v805_v19, 2 }
0x13f5   :  { %v808_v24 = vpop.f32.mrb[18].mxu0 }
0x13f6   :  { %v823_v25 = vrot.slane %v821_v20, 2  ;;  %v984_v26 = vpop.f32.mrb[19].mxu0  ;;  %v814_v28 = vadd.f32 %v812_v27, %v1129_v14 }
0x13f8   :  { %824 = vrot.lane.b32.xlu0 %v823_v25, %s1044_s27  ;;  %v888_v29 = vmul.f32 -1.442695, %v814_v28 }
0x13fa   :  { %1036 = vpow2.f32 %v888_v29 }
0x1404   :  { %v1037_v31 = vpop.eup %1036 }
0x1405   :  { %v818_v32 = vadd.f32 1.0, %v1037_v31 }
0x1407   :  { %1038 = vrcp.f32 %v818_v32 }
0x1411   :  { %v1039_v13 = vpop.eup %1038 }
0x1412   :  { %v834_v52 = vsub.f32 1.0, %v1039_v13  ;;  %v842_v56 = vmul.f32 %v1039_v13, %v840_v53 }
0x146a   :  { %v825_v0 = vpop.permute.xlu0 %824 }
0x146b   :  { %v827_v4 = vmul.f32 %v1039_v13, %v825_v0 }
0x146d   :  { %829 = vrot.lane.b32.xlu1 %v827_v4, %s1044_s27 }
0x1471   :  { %201 = vrot.lane.b32.xlu1 %v200_v39, %s1046_s3 }
0x1475   :  { %388 = vrot.lane.b32.xlu1 %v387_v42, %s1045_s4 }
0x1479   :  { %484 = vrot.lane.b32.xlu1 %v483_v44, %s1044_s27 }
0x14df   :  { %v830_v46 = vpop.permute.xlu1 %829 }
0x14e0   :  { %v832_v37 = vadd.f32 %v830_v46, %v1129_v14 }
0x14e2   :  { %1040 = vtanh.f32 %v832_v37 }
0x14e3   :  { %v202_v48 = vpop.permute.xlu1 %201 }
0x14e4   :  { %205 = vst.msk [vmem:[%s1313_s5] sm:$0x3] %vm25_vm1, %v202_v48 }
0x14e5   :  { %297 = vst.msk [vmem:[%s1313_s5] sm:$0x3] %vm296_vm5, %v294_v30 }
0x14e7   :  { %v389_v57 = vpop.permute.xlu1 %388 }
0x14e8   :  { %392 = vst.msk [vmem:[%s1313_s5] sm:$0x3] %vm391_vm6, %v389_v57 }
0x14eb   :  { %v485_v14 = vpop.permute.xlu1 %484 }
0x14ec   :  { %v1041_v62 = vpop.eup %1040  ;;  %488 = vst.msk [vmem:[%s1313_s5] sm:$0x3] %vm487_vm7, %v485_v14 }
0x14ed   :  { %836 = vrot.lane.b32.xlu0 %v1041_v62, %s1046_s3 }
0x14f1   :  { %574 = vrot.lane.b32.xlu0 %v573_v49, %s1046_s3 }
0x14f5   :  { %759 = vrot.lane.b32.xlu0 %v758_v51, %s1045_s4 }
0x155f   :  { %v837_v55 = vpop.permute.xlu0 %836 }
0x1560   :  { %v839_v58 = vmul.f32 %v837_v55, %v834_v52 }
0x1562   :  { %v843_v59 = vadd.f32 %v842_v56, %v839_v58 }
0x1563   :  { %v575_v21 = vpop.permute.xlu0 %574 }
0x1564   :  { %v845_v23 = vcombine.high %v843_v59, %v843_v59  ;;  %577 = vst.msk [vmem:[%s1313_s5 + $0x2] sm:$0x3] %vm25_vm1, %v575_v21  ;;  %858 = vrot.lane.b32.xlu1 %v843_v59, %s1046_s3 }
0x1565   :  { %668 = vst.msk [vmem:[%s1313_s5 + $0x2] sm:$0x3] %vm296_vm5, %v666_v60 }
0x1566   :  { %v852_v47 = vrot.slane %v845_v23, %v199_v38 }
0x1567   :  { %v760_v61 = vpop.permute.xlu0 %759 }
0x1568   :  { %762 = vst.msk [vmem:[%s1313_s5 + $0x2] sm:$0x3] %vm391_vm6, %v760_v61  ;;  %v853_v63 = vcombine.high %v852_v47, %v852_v47 }
0x156a   :  { %854 = vrot.lane.b32.xlu0 %v853_v63, %s1044_s27 }
0x15d6   :  { %v859_v2 = vpop.permute.xlu1 %858 }
0x15d7   :  { %862 = vst.msk [vmem:[#allocation2 - $0x6] sm:$0xc0] %vm861_vm8, %v859_v2 }
0x15dc   :  { %v855_v3 = vpop.permute.xlu0 %854 }
0x15dd   :  { %857 = vst.msk [vmem:[%s1313_s5 + $0x2] sm:$0x3] %vm487_vm7, %v855_v3 }

</bundles_post_ra>
